<compile_context>
chip_gen: v7x
topology: tpu7x:2x2x1
jax: 0.10.0
libtpu: 0.0.40
codegen_flags: <defaults>
</compile_context>

<pallas_src>
import functools

import jax
import jax.numpy as jnp
from jax.experimental import pallas as pl
from jax.experimental.pallas import tpu as pltpu


def mlp_kernel(xT_ref, w1_ref, b1_ref, w2_ref, b2_ref, oT_ref):
    """Transposed MLP tile: oT = W2 @ relu(W1 @ xT + b1) + b2.

    Shapes (per grid step):
      xT_ref : (K, TB)   batch on lanes
      w1_ref : (H, K)    PyTorch-native (out_features, in_features)
      b1_ref : (H, 1)
      w2_ref : (O, H)
      b2_ref : (O, 1)
      oT_ref : (O, TB)
    """
    xT = xT_ref[...]                      # (K, TB)
    w1 = w1_ref[...]                      # (H, K)
    w2 = w2_ref[...]                      # (O, H)
    K = xT.shape[0]
    H = w1.shape[0]
    O = w2.shape[0]
    TB = xT.shape[1]

    # fc1: hT = W1 @ xT + b1  -- K unrolled VPU outer-product mul/adds.
    hT = jnp.broadcast_to(b1_ref[...], (H, TB)).astype(jnp.float32)
    for k in range(K):
        hT = hT + w1[:, k : k + 1] * xT[k : k + 1, :]
    hT = jnp.maximum(hT, 0.0)             # torch.relu

    # fc2: oT = W2 @ hT + b2  -- H unrolled VPU outer-product mul/adds.
    oT = jnp.broadcast_to(b2_ref[...], (O, TB)).astype(jnp.float32)
    for j in range(H):
        oT = oT + w2[:, j : j + 1] * hT[j : j + 1, :]

    oT_ref[...] = oT.astype(oT_ref.dtype)


@functools.partial(jax.jit, static_argnames=("tb",))
def net_forward(x, w1, b1, w2, b2, *, tb=128):
    """Forward pass of Net.

    x : (B, input_d) f32   (same layout as the PyTorch module input)
    w1: (8, input_d) f32   (PyTorch nn.Linear weight layout)
    b1: (8, 1) f32
    w2: (O, 8) f32
    b2: (O, 1) f32
    returns (B, O) f32
    """
    B, K = x.shape
    H = w1.shape[0]
    O = w2.shape[0]

    # Pad batch to a multiple of the lane tile and transpose so batch is the
    # lane (last) axis.  Transpose/pad live in the XLA wrapper, not the kernel.
    grid_b = pl.cdiv(B, tb)
    Bp = grid_b * tb
    xT = jnp.pad(x.T, ((0, 0), (0, Bp - B)))          # (K, Bp)

    outT = pl.pallas_call(
        mlp_kernel,
        out_shape=jax.ShapeDtypeStruct((O, Bp), jnp.float32),
        grid=(grid_b,),
        in_specs=[
            pl.BlockSpec((K, tb), lambda i: (0, i)),   # streamed x tile
            pl.BlockSpec((H, K), lambda i: (0, 0)),    # resident weights
            pl.BlockSpec((H, 1), lambda i: (0, 0)),
            pl.BlockSpec((O, H), lambda i: (0, 0)),
            pl.BlockSpec((O, 1), lambda i: (0, 0)),
        ],
        out_specs=pl.BlockSpec((O, tb), lambda i: (0, i)),
        compiler_params=pltpu.CompilerParams(
            dimension_semantics=("parallel",),
        ),
    )(xT, w1, b1, w2, b2)

    return outT[:, :B].T                               # (B, O)


def init_params(key, input_d, output_dim):
    """Deterministic init mimicking nn.Linear default (uniform +/- 1/sqrt(fan_in)).

    Weights are kept in the PyTorch-native (out_features, in_features) layout,
    biases as column vectors for the transposed kernel math.
    """
    k1, k2, k3, k4 = jax.random.split(key, 4)
    bound1 = 1.0 / jnp.sqrt(jnp.float32(input_d))
    w1 = jax.random.uniform(k1, (8, input_d), jnp.float32, -bound1, bound1)
    b1 = jax.random.uniform(k2, (8, 1), jnp.float32, -bound1, bound1)
    bound2 = 1.0 / jnp.sqrt(jnp.float32(8))
    w2 = jax.random.uniform(k3, (output_dim, 8), jnp.float32, -bound2, bound2)
    b2 = jax.random.uniform(k4, (output_dim, 1), jnp.float32, -bound2, bound2)
    return w1, b1, w2, b2


def reference_forward(x, w1, b1, w2, b2):
    h = jnp.maximum(x @ w1.T + b1.T, 0.0)
    return h @ w2.T + b2.T


if __name__ == "__main__":
    # Single-qubit QNN head: quantum expectation values of dim 4 -> 2 actions.
    # Batch of 256 so the lane axis (after the transpose) is fully dense and
    # the grid exercises the parallel batch axis (2 tiles of 128).
    B, input_d, output_dim = 256, 4, 2

    key = jax.random.PRNGKey(0)
    kx, kp = jax.random.split(key)
    x = jax.random.normal(kx, (B, input_d), jnp.float32)
    w1, b1, w2, b2 = init_params(kp, input_d, output_dim)

    out = net_forward(x, w1, b1, w2, b2)
    out = jax.block_until_ready(out)

    ref = reference_forward(x, w1, b1, w2, b2)
    assert out.shape == (B, output_dim)
    assert jnp.allclose(out, ref, atol=1e-5, rtol=1e-5), "mismatch vs reference"

    print("KERNEL_OK")
</pallas_src>

<mosaic_0001>
module attributes {stable_mosaic.version = 11 : i64} {
  func.func @mlp_kernel(%arg0: i32, %arg1: memref<4x128xf32, #tpu.memory_space<vmem>>, %arg2: memref<8x4xf32, #tpu.memory_space<vmem>>, %arg3: memref<8x1xf32, #tpu.memory_space<vmem>>, %arg4: memref<2x8xf32, #tpu.memory_space<vmem>>, %arg5: memref<2x1xf32, #tpu.memory_space<vmem>>, %arg6: memref<2x128xf32, #tpu.memory_space<vmem>>) attributes {dimension_semantics = [#tpu.dimension_semantics<parallel>], iteration_bounds = array<i64: 2>, scalar_prefetch = 0 : i64, scratch_operands = 0 : i64, tpu.core_type = #tpu.core_type<tc>, window_params = [{transform_indices = @transform_0, window_bounds = array<i64: 4, 128>}, {pipeline_mode = #tpu.pipeline_mode<synchronous>, transform_indices = @transform_1, window_bounds = array<i64: 8, 4>}, {pipeline_mode = #tpu.pipeline_mode<synchronous>, transform_indices = @transform_2, window_bounds = array<i64: 8, 1>}, {pipeline_mode = #tpu.pipeline_mode<synchronous>, transform_indices = @transform_3, window_bounds = array<i64: 2, 8>}, {pipeline_mode = #tpu.pipeline_mode<synchronous>, transform_indices = @transform_4, window_bounds = array<i64: 2, 1>}, {transform_indices = @transform_5, window_bounds = array<i64: 2, 128>}]} {
    %c0 = arith.constant 0 : index
    %c0_0 = arith.constant 0 : index
    %0 = vector.load %arg1[%c0, %c0_0] : memref<4x128xf32, #tpu.memory_space<vmem>>, vector<4x128xf32>
    %c0_1 = arith.constant 0 : index
    %c0_2 = arith.constant 0 : index
    %1 = vector.load %arg2[%c0_1, %c0_2] : memref<8x4xf32, #tpu.memory_space<vmem>>, vector<8x4xf32>
    %c0_3 = arith.constant 0 : index
    %c0_4 = arith.constant 0 : index
    %2 = vector.load %arg4[%c0_3, %c0_4] : memref<2x8xf32, #tpu.memory_space<vmem>>, vector<2x8xf32>
    %c0_5 = arith.constant 0 : index
    %c0_6 = arith.constant 0 : index
    %3 = vector.load %arg3[%c0_5, %c0_6] : memref<8x1xf32, #tpu.memory_space<vmem>>, vector<8x1xf32>
    %4 = vector.shape_cast %3 : vector<8x1xf32> to vector<8x1xf32>
    %5 = vector.broadcast %4 : vector<8x1xf32> to vector<8x128xf32>
    %6 = vector.extract_strided_slice %1 {offsets = [0, 0], sizes = [8, 1], strides = [1, 1]} : vector<8x4xf32> to vector<8x1xf32>
    %7 = vector.extract_strided_slice %0 {offsets = [0, 0], sizes = [1, 128], strides = [1, 1]} : vector<4x128xf32> to vector<1x128xf32>
    %8 = vector.broadcast %6 : vector<8x1xf32> to vector<8x128xf32>
    %9 = vector.broadcast %7 : vector<1x128xf32> to vector<8x128xf32>
    %10 = arith.mulf %8, %9 : vector<8x128xf32>
    %11 = arith.addf %5, %10 : vector<8x128xf32>
    %12 = vector.extract_strided_slice %1 {offsets = [0, 1], sizes = [8, 1], strides = [1, 1]} : vector<8x4xf32> to vector<8x1xf32>
    %13 = vector.extract_strided_slice %0 {offsets = [1, 0], sizes = [1, 128], strides = [1, 1]} : vector<4x128xf32> to vector<1x128xf32>
    %14 = vector.broadcast %12 : vector<8x1xf32> to vector<8x128xf32>
    %15 = vector.broadcast %13 : vector<1x128xf32> to vector<8x128xf32>
    %16 = arith.mulf %14, %15 : vector<8x128xf32>
    %17 = arith.addf %11, %16 : vector<8x128xf32>
    %18 = vector.extract_strided_slice %1 {offsets = [0, 2], sizes = [8, 1], strides = [1, 1]} : vector<8x4xf32> to vector<8x1xf32>
    %19 = vector.extract_strided_slice %0 {offsets = [2, 0], sizes = [1, 128], strides = [1, 1]} : vector<4x128xf32> to vector<1x128xf32>
    %20 = vector.broadcast %18 : vector<8x1xf32> to vector<8x128xf32>
    %21 = vector.broadcast %19 : vector<1x128xf32> to vector<8x128xf32>
    %22 = arith.mulf %20, %21 : vector<8x128xf32>
    %23 = arith.addf %17, %22 : vector<8x128xf32>
    %24 = vector.extract_strided_slice %1 {offsets = [0, 3], sizes = [8, 1], strides = [1, 1]} : vector<8x4xf32> to vector<8x1xf32>
    %25 = vector.extract_strided_slice %0 {offsets = [3, 0], sizes = [1, 128], strides = [1, 1]} : vector<4x128xf32> to vector<1x128xf32>
    %26 = vector.broadcast %24 : vector<8x1xf32> to vector<8x128xf32>
    %27 = vector.broadcast %25 : vector<1x128xf32> to vector<8x128xf32>
    %28 = arith.mulf %26, %27 : vector<8x128xf32>
    %29 = arith.addf %23, %28 : vector<8x128xf32>
    %cst = arith.constant 0.000000e+00 : f32
    %30 = vector.broadcast %cst : f32 to vector<8x128xf32>
    %31 = arith.maximumf %29, %30 : vector<8x128xf32>
    %c0_7 = arith.constant 0 : index
    %c0_8 = arith.constant 0 : index
    %32 = vector.load %arg5[%c0_7, %c0_8] : memref<2x1xf32, #tpu.memory_space<vmem>>, vector<2x1xf32>
    %33 = vector.shape_cast %32 : vector<2x1xf32> to vector<2x1xf32>
    %34 = vector.broadcast %33 : vector<2x1xf32> to vector<2x128xf32>
    %35 = vector.extract_strided_slice %2 {offsets = [0, 0], sizes = [2, 1], strides = [1, 1]} : vector<2x8xf32> to vector<2x1xf32>
    %36 = vector.extract_strided_slice %31 {offsets = [0, 0], sizes = [1, 128], strides = [1, 1]} : vector<8x128xf32> to vector<1x128xf32>
    %37 = vector.broadcast %35 : vector<2x1xf32> to vector<2x128xf32>
    %38 = vector.broadcast %36 : vector<1x128xf32> to vector<2x128xf32>
    %39 = arith.mulf %37, %38 : vector<2x128xf32>
    %40 = arith.addf %34, %39 : vector<2x128xf32>
    %41 = vector.extract_strided_slice %2 {offsets = [0, 1], sizes = [2, 1], strides = [1, 1]} : vector<2x8xf32> to vector<2x1xf32>
    %42 = vector.extract_strided_slice %31 {offsets = [1, 0], sizes = [1, 128], strides = [1, 1]} : vector<8x128xf32> to vector<1x128xf32>
    %43 = vector.broadcast %41 : vector<2x1xf32> to vector<2x128xf32>
    %44 = vector.broadcast %42 : vector<1x128xf32> to vector<2x128xf32>
    %45 = arith.mulf %43, %44 : vector<2x128xf32>
    %46 = arith.addf %40, %45 : vector<2x128xf32>
    %47 = vector.extract_strided_slice %2 {offsets = [0, 2], sizes = [2, 1], strides = [1, 1]} : vector<2x8xf32> to vector<2x1xf32>
    %48 = vector.extract_strided_slice %31 {offsets = [2, 0], sizes = [1, 128], strides = [1, 1]} : vector<8x128xf32> to vector<1x128xf32>
    %49 = vector.broadcast %47 : vector<2x1xf32> to vector<2x128xf32>
    %50 = vector.broadcast %48 : vector<1x128xf32> to vector<2x128xf32>
    %51 = arith.mulf %49, %50 : vector<2x128xf32>
    %52 = arith.addf %46, %51 : vector<2x128xf32>
    %53 = vector.extract_strided_slice %2 {offsets = [0, 3], sizes = [2, 1], strides = [1, 1]} : vector<2x8xf32> to vector<2x1xf32>
    %54 = vector.extract_strided_slice %31 {offsets = [3, 0], sizes = [1, 128], strides = [1, 1]} : vector<8x128xf32> to vector<1x128xf32>
    %55 = vector.broadcast %53 : vector<2x1xf32> to vector<2x128xf32>
    %56 = vector.broadcast %54 : vector<1x128xf32> to vector<2x128xf32>
    %57 = arith.mulf %55, %56 : vector<2x128xf32>
    %58 = arith.addf %52, %57 : vector<2x128xf32>
    %59 = vector.extract_strided_slice %2 {offsets = [0, 4], sizes = [2, 1], strides = [1, 1]} : vector<2x8xf32> to vector<2x1xf32>
    %60 = vector.extract_strided_slice %31 {offsets = [4, 0], sizes = [1, 128], strides = [1, 1]} : vector<8x128xf32> to vector<1x128xf32>
    %61 = vector.broadcast %59 : vector<2x1xf32> to vector<2x128xf32>
    %62 = vector.broadcast %60 : vector<1x128xf32> to vector<2x128xf32>
    %63 = arith.mulf %61, %62 : vector<2x128xf32>
    %64 = arith.addf %58, %63 : vector<2x128xf32>
    %65 = vector.extract_strided_slice %2 {offsets = [0, 5], sizes = [2, 1], strides = [1, 1]} : vector<2x8xf32> to vector<2x1xf32>
    %66 = vector.extract_strided_slice %31 {offsets = [5, 0], sizes = [1, 128], strides = [1, 1]} : vector<8x128xf32> to vector<1x128xf32>
    %67 = vector.broadcast %65 : vector<2x1xf32> to vector<2x128xf32>
    %68 = vector.broadcast %66 : vector<1x128xf32> to vector<2x128xf32>
    %69 = arith.mulf %67, %68 : vector<2x128xf32>
    %70 = arith.addf %64, %69 : vector<2x128xf32>
    %71 = vector.extract_strided_slice %2 {offsets = [0, 6], sizes = [2, 1], strides = [1, 1]} : vector<2x8xf32> to vector<2x1xf32>
    %72 = vector.extract_strided_slice %31 {offsets = [6, 0], sizes = [1, 128], strides = [1, 1]} : vector<8x128xf32> to vector<1x128xf32>
    %73 = vector.broadcast %71 : vector<2x1xf32> to vector<2x128xf32>
    %74 = vector.broadcast %72 : vector<1x128xf32> to vector<2x128xf32>
    %75 = arith.mulf %73, %74 : vector<2x128xf32>
    %76 = arith.addf %70, %75 : vector<2x128xf32>
    %77 = vector.extract_strided_slice %2 {offsets = [0, 7], sizes = [2, 1], strides = [1, 1]} : vector<2x8xf32> to vector<2x1xf32>
    %78 = vector.extract_strided_slice %31 {offsets = [7, 0], sizes = [1, 128], strides = [1, 1]} : vector<8x128xf32> to vector<1x128xf32>
    %79 = vector.broadcast %77 : vector<2x1xf32> to vector<2x128xf32>
    %80 = vector.broadcast %78 : vector<1x128xf32> to vector<2x128xf32>
    %81 = arith.mulf %79, %80 : vector<2x128xf32>
    %82 = arith.addf %76, %81 : vector<2x128xf32>
    %c0_9 = arith.constant 0 : index
    %c0_10 = arith.constant 0 : index
    %83 = vector.load %arg6[%c0_9, %c0_10] : memref<2x128xf32, #tpu.memory_space<vmem>>, vector<2x128xf32>
    tpu.vector_store %arg6[%c0_9, %c0_10], %82 {strides = array<i32>} : memref<2x128xf32, #tpu.memory_space<vmem>>, vector<2x128xf32>,
    return
  }
  func.func @transform_0(%arg0: i32) -> (i32, i32) {
    %c0_i32 = arith.constant 0 : i32
    %c0_i32_0 = arith.constant 0 : i32
    return %c0_i32, %arg0 : i32, i32
  }
  func.func @transform_1(%arg0: i32) -> (i32, i32) {
    %c0_i32 = arith.constant 0 : i32
    %c0_i32_0 = arith.constant 0 : i32
    %c0_i32_1 = arith.constant 0 : i32
    return %c0_i32, %c0_i32_0 : i32, i32
  }
  func.func @transform_2(%arg0: i32) -> (i32, i32) {
    %c0_i32 = arith.constant 0 : i32
    %c0_i32_0 = arith.constant 0 : i32
    %c0_i32_1 = arith.constant 0 : i32
    return %c0_i32, %c0_i32_0 : i32, i32
  }
  func.func @transform_3(%arg0: i32) -> (i32, i32) {
    %c0_i32 = arith.constant 0 : i32
    %c0_i32_0 = arith.constant 0 : i32
    %c0_i32_1 = arith.constant 0 : i32
    return %c0_i32, %c0_i32_0 : i32, i32
  }
  func.func @transform_4(%arg0: i32) -> (i32, i32) {
    %c0_i32 = arith.constant 0 : i32
    %c0_i32_0 = arith.constant 0 : i32
    %c0_i32_1 = arith.constant 0 : i32
    return %c0_i32, %c0_i32_0 : i32, i32
  }
  func.func @transform_5(%arg0: i32) -> (i32, i32) {
    %c0_i32 = arith.constant 0 : i32
    %c0_i32_0 = arith.constant 0 : i32
    return %c0_i32, %arg0 : i32, i32
  }
}

</mosaic_0001>

<bundles_post_ra>
// kernel: net_forward.1
= control target key start
LH: loop header
LB: loop body
LE: loop exit
PB: predicated region body
PF: predicated region fallthrough
CT: control target
= control target key end

     0   :  { %10 = vsyncpa [#allocation3], 0  ;;  %s716_s0 = inlined_call_operand.vmem [shape: f32[4,256], index: 0, kind: input, shape index: {}]   ;;  %s717_s1 = inlined_call_operand.vmem [shape: f32[8,4], index: 1, kind: input, shape index: {}]   ;;  %s718_s2 = inlined_call_operand.vmem [shape: f32[8,1], index: 2, kind: input, shape index: {}]   ;;  %s719_s3 = inlined_call_operand.vmem [shape: f32[2,8], index: 3, kind: input, shape index: {}]   ;;  %s720_s4 = inlined_call_operand.vmem [shape: f32[2,1], index: 4, kind: input, shape index: {}]   ;;  %s721_s5 = inlined_call_operand.hbm [shape: f32[2,256], index: 5, kind: output, shape index: {}]  }
   0x1   :  { %12 = vsyncpa [#allocation3 + $0x1], 0  ;;  %s604_s18 = smov 0   ;;  %s606_s19 = smov 0  }
   0x2   :  { %s608_s20 = smov 0   ;;  %s610_s21 = smov 0  }
   0x3 LB: > { %s625_s22 = sadd.s32 4294967295, %s563_s21   ;;  %s432_s23 = sadd.s32 4294967294, %s563_s21   ;;  %s563_s21 = sphi %s610_s21, %s727_s21   ;;  %s559_s20 = sphi %s608_s20, %s726_s20   ;;  %s555_s19 = sphi %s606_s19, %s725_s19   ;;  %s551_s18 = sphi %s604_s18, %s724_s18  }
   0x4   : > { %s629_s24 = sadd.s32 1, %s563_s21   ;;  %s135_s25 = sadd.s32 1, %s559_s20 }
   0x5   : > { %s132_s26 = ssub.s32 %s563_s21, %s629_s24  ;;  %p145_p0 = scmp.ne.s32.totalorder %s559_s20, %s555_s19 }
   0x6   : > { %p133_p1 = scmp.eq.s32.totalorder %s132_s26, 0  ;;  %p146_p2 = scmp.eq.s32.totalorder %s625_s22, 1 }
   0x7   : > { %p151_p3 = scmp.ne.s32.totalorder %s555_s19, %s551_s18  ;;  %p152_p4 = scmp.eq.s32.totalorder %s432_s23, 1 }
   0x8   : > { %s640_s27 = scalar_select %p133_p1, %s559_s20, %s135_s25  }
   0x9   : > { %p642_p5 = por %p146_p2, %p145_p0  ;;  %p646_p6 = por %p152_p4, %p151_p3 }
   0xa   : > { %p435_p7 = scmp.ge.s32.totalorder %s563_s21, 1  ;;  %p189_p8 = scmp.lt.s32.totalorder %s563_s21, 3 }
   0xc   : > { %p190_p9 = pnand %p435_p7, %p189_p8 }
   0xd   : > { %v221_v0 = vld [vmem:[%s717_s1] sm:$0xff] (!%p190_p9)  ;;  %v565_v1 = vmov (!%p190_p9), 1   ;;  %v566_v2 = vmov (!%p190_p9), 0   ;;  %v567_v4 = vmov (!%p190_p9), 2   ;;  %v568_v6 = vmov (!%p190_p9), 3   ;;  %p216_p10 = scmp.lt.s32.totalorder (!%p190_p9), %s625_s22, 1 }
   0xe   : > { %193 = sbr.rel (%p190_p9) target bundleno = 197 (0xc5), region = 40  ;;  %490 = vset.pattern.permute.xlu1 (!%p190_p9), %v565_v1  ;;  %489 = vset.pattern.permute.xlu0 (!%p190_p9), %v566_v2  ;;  %v223_v3 = vld [vmem:[%s718_s2] sm:$0xff] (!%p190_p9)  ;;  %v569_v8 = vmov (!%p190_p9), 4   ;;  %v570_v9 = vmov (!%p190_p9), 7   ;;  %v571_v10 = vmov (!%p190_p9), 5   ;;  %v572_v11 = vmov (!%p190_p9), 6  }
   0xf   : > { %241 = vperm.xlu1 (!%p190_p9), %490, %v221_v0   ;;  %231 = vperm.xlu0 (!%p190_p9), %489, %v221_v0   ;;  %v222_v5 = vld [vmem:[%s719_s3] sm:$0x3] (!%p190_p9)  ;;  %v234_v12 = vlaneseq (!%p190_p9)  ;;  %s213_s23 = sand.u32 (!%p190_p9), 1, %s555_s19   ;;  %s439_s26 = sshll.u32 (!%p190_p9), %s625_s22, 5 }
  0x10   : > { %v271_v7 = vld [vmem:[%s720_s4] sm:$0x3] (!%p190_p9)  ;;  %s436_s25 = sshll.u32 (!%p190_p9), %s213_s23, 1  ;;  %s674_s9 = scalar_lea.hbm (!%p190_p9), %s721_s5, %s439_s26 }
  0x11   : > { %v235_v13 = vshrl.u32 (!%p190_p9), %v234_v12, 7  ;;  %s215_s30 = scalar_lea.vmem (!%p190_p9), [#allocation2], %s436_s25  ;;  %s360_s10 = scalar_lea.sflag (!%p190_p9), [#allocation3], %s213_s23 }
  0x12   : > { %s373_s6 = sshll.u32 (!%p190_p9), %s215_s30, 4  ;;  %s676_s6 = int_to_ptr.vmem [resolvable:$true] %s373_s6 }
  0x13   : > { %491 = vset.pattern.permute.xlu1 (!%p190_p9), %v567_v4  ;;  %226 = vperm.xlu0 (!%p190_p9), %489, %v223_v3   ;;  %v236_v14 = vsub.s32 (!%p190_p9), 0, %v235_v13  ;;  %v246_v16 = vsub.s32 (!%p190_p9), 1, %v235_v13  ;;  %v256_v18 = vsub.s32 (!%p190_p9), 2, %v235_v13  ;;  %v266_v24 = vsub.s32 (!%p190_p9), 3, %v235_v13  ;;  %s501_s11 = scalar_lea.vmem (!%p190_p9), %s676_s6, 32 }
  0x14   : > { %251 = vperm.xlu1 (!%p190_p9), %491, %v221_v0   ;;  %v324_v49 = vsub.s32 (!%p190_p9), 4, %v235_v13  ;;  %v334_v54 = vsub.s32 (!%p190_p9), 5, %v235_v13  ;;  %v344_v61 = vsub.s32 (!%p190_p9), 6, %v235_v13  ;;  %v354_v62 = vsub.s32 (!%p190_p9), 7, %v235_v13  ;;  %p502_p11 = scmp.ne.s32.totalorder (!%p190_p9), %s676_s6, %s501_s11 }
  0x15   : > { %s217_s13 = scalar_select %p216_p10, %s625_s22, 1 }
  0x16   : > { %p503_p12 = pnand %p502_p11, %p642_p5  ;;  %s573_s22 = smov [#allocation2]  }
  0x17   : > { %492 = vset.pattern.permute.xlu0 %v568_v6  ;;  %s437_s14 = sshll.u32 %s217_s13, 2  ;;  %s505_s12 = sshll.u32 %s573_s22, 4  ;;  %s506_s12 = int_to_ptr.vmem [resolvable:$false] %s505_s12 }
  0x18   : > { %493 = vset.pattern.permute.xlu1 %v566_v2  ;;  %261 = vperm.xlu0 %492, %v221_v0   ;;  %s219_s17 = scalar_lea.vmem %s716_s0, %s437_s14  ;;  %p504_p13 = pneg %p503_p12 }
  0x19   : > { %279 = vperm.xlu1 %493, %v222_v5   ;;  %v220_v15 = vld [vmem:[%s219_s17] sm:$0xf]  ;;  %s507_s13 = scalar_lea.vmem %s506_s12, 64  ;;  %p508_p0 = scmp.lt.s32.totalorder %s676_s6, %s506_s12 }
  0x1a   : > { %v237_v17 = vrot.slane %v220_v15, %v236_v14  ;;  %v247_v21 = vrot.slane %v220_v15, %v246_v16  ;;  %v257_v23 = vrot.slane %v220_v15, %v256_v18  ;;  %v267_v30 = vrot.slane %v220_v15, %v266_v24  ;;  %p509_p1 = scmp.lt.s32.totalorder %s507_s13, %s501_s11 }
  0x1c   : > { %494 = vset.pattern.permute.xlu0 %v565_v1  ;;  %p510_p2 = por %p509_p1, %p508_p0 }
  0x1d   : > { %274 = vperm.xlu1 %493, %v271_v7   ;;  %289 = vperm.xlu0 %494, %v222_v5  }
  0x1e   : > { %p511_p3 = pnand %p510_p2, %p504_p13 }
  0x21   : > { %495 = vset.pattern.permute.xlu1 %v567_v4  ;;  %497 = vset.pattern.permute.xlu0 %v569_v8 }
  0x22   : > { %299 = vperm.xlu1 %495, %v222_v5   ;;  %319 = vperm.xlu0 %497, %v222_v5  }
  0x26   : > { %496 = vset.pattern.permute.xlu1 %v568_v6  ;;  %500 = vset.pattern.permute.xlu0 %v570_v9 }
  0x27   : > { %309 = vperm.xlu1 %496, %v222_v5   ;;  %349 = vperm.xlu0 %500, %v222_v5  }
  0x2b   : > { %498 = vset.pattern.permute.xlu1 %v571_v10 }
  0x2c   : > { %329 = vperm.xlu1 %498, %v222_v5  }
  0x30   : > { %499 = vset.pattern.permute.xlu1 %v572_v11 }
  0x31   : > { %339 = vperm.xlu1 %499, %v222_v5  }
  0x8e   : > { %v242_v19 = vpop.permute.xlu1 %241  ;;  %v232_v20 = vpop.permute.xlu0 %231 }
  0x8f   : > { %v238_v22 = vmul.f32 %v237_v17, %v232_v20  ;;  %v248_v26 = vmul.f32 %v247_v21, %v242_v19 }
  0x92   : > { %v227_v25 = vpop.permute.xlu0 %226 }
  0x93   : > { %v239_v27 = vadd.f32 %v238_v22, %v227_v25  ;;  %v252_v28 = vpop.permute.xlu1 %251 }
  0x94   : > { %v258_v29 = vmul.f32 %v257_v23, %v252_v28 }
  0x95   : > { %v249_v31 = vadd.f32 %v248_v26, %v239_v27 }
  0x97   : > { %v259_v32 = vadd.f32 %v258_v29, %v249_v31  ;;  %v262_v33 = vpop.permute.xlu0 %261 }
  0x98   : > { %v268_v34 = vmul.f32 %v267_v30, %v262_v33  ;;  %v280_v35 = vpop.permute.xlu1 %279 }
  0x9a   : > { %v269_v36 = vadd.f32 %v268_v34, %v259_v32 }
  0x9c   : > { %v270_v37 = vmax.f32 %v269_v36, 0.0  ;;  %v275_v38 = vpop.permute.xlu1 %274  ;;  %v290_v42 = vpop.permute.xlu0 %289 }
  0x9e   : > { %v285_v39 = vrot.slane %v270_v37, %v236_v14  ;;  %v295_v40 = vrot.slane %v270_v37, %v246_v16  ;;  %v305_v46 = vrot.slane %v270_v37, %v256_v18  ;;  %v315_v50 = vrot.slane %v270_v37, %v266_v24 }
  0x9f   : > { %v325_v56 = vrot.slane %v270_v37, %v324_v49  ;;  %v335_v60 = vrot.slane %v270_v37, %v334_v54  ;;  %v345_v1 = vrot.slane %v270_v37, %v344_v61  ;;  %v355_v4 = vrot.slane %v270_v37, %v354_v62 }
  0xa0   : > { %v286_v41 = vmul.f32 %v285_v39, %v280_v35  ;;  %v296_v45 = vmul.f32 %v295_v40, %v290_v42 }
  0xa1   : > { %v300_v43 = vpop.permute.xlu1 %299  ;;  %v320_v55 = vpop.permute.xlu0 %319 }
  0xa2   : > { %v287_v44 = vadd.f32 %v286_v41, %v275_v38  ;;  %v306_v48 = vmul.f32 %v305_v46, %v300_v43  ;;  %v326_v58 = vmul.f32 %v325_v56, %v320_v55 }
  0xa4   : > { %v297_v47 = vadd.f32 %v296_v45, %v287_v44 }
  0xa6   : > { %v307_v51 = vadd.f32 %v306_v48, %v297_v47  ;;  %v310_v52 = vpop.permute.xlu1 %309  ;;  %v350_v2 = vpop.permute.xlu0 %349 }
  0xa7   : > { %v316_v53 = vmul.f32 %v315_v50, %v310_v52  ;;  %v356_v7 = vmul.f32 %v355_v4, %v350_v2 }
  0xa9   : > { %v317_v57 = vadd.f32 %v316_v53, %v307_v51 }
  0xab   : > { %v330_v59 = vpop.permute.xlu1 %329  ;;  %v327_v63 = vadd.f32 %v326_v58, %v317_v57 }
  0xac   : > { %v336_v0 = vmul.f32 %v335_v60, %v330_v59 }
  0xae   : > { %v337_v5 = vadd.f32 %v336_v0, %v327_v63 }
  0xb0   : > { %v340_v3 = vpop.permute.xlu1 %339 }
  0xb1   : > { %v346_v6 = vmul.f32 %v345_v1, %v340_v3 }
  0xb3   : > { %v347_v8 = vadd.f32 %v346_v6, %v337_v5 }
  0xb5   : > { %v357_v9 = vadd.f32 %v356_v7, %v347_v8 }
  0xb7   : > { %358 = vst [vmem:[%s215_s30] sm:$0x3] %v357_v9 }
  0xb8   : > { %514 = shalt.err (!%p511_p3)
}
  0xb9   : > { %s515_s14 = scalar_lea.hbm %s674_s9, 32  ;;  %s519_s17 = scalar_lea.hbm %s721_s5, 64 }
  0xba   : > { %p516_p4 = scmp.ne.s32.totalorder %s674_s9, %s515_s14  ;;  %p520_p9 = scmp.lt.u32.totalorder %s674_s9, %s721_s5 }
  0xbb   : > { %p521_p10 = scmp.lt.u32.totalorder %s519_s17, %s515_s14  ;;  %p523_p12 = scmp.lt.u32.totalorder %s515_s14, %s674_s9 }
  0xbc   : > { %p517_p7 = pnand %p516_p4, %p642_p5 }
  0xbd   : > { %p522_p11 = por %p521_p10, %p520_p9 }
  0xbe   : > { %p518_p8 = pneg %p517_p7 }
  0xbf   : > { %p524_p13 = por %p523_p12, %p522_p11 }
  0xc1   : > { %p525_p0 = pnand %p524_p13, %p518_p8 }
  0xc3   : > { %528 = shalt.err (!%p525_p0)
}
  0xc4   : > { %442 = dma.vmem_to_hbm [thread:$0]  (%p642_p5), %s676_s6, 32, %s674_s9, %s360_s10  }
  0xc5 PF: > { %p448_p1 = scmp.ge.s32.totalorder %s563_s21, 2  ;;  %s385_s26 = sand.u32 1, %s551_s18  }
  0xc6   : > { %s386_s30 = scalar_lea.sflag [#allocation3], %s385_s26 }
  0xc7   : > { %p445_p2 = pnand %p448_p1, %p646_p6 }
  0xc9   : > { %546 = dma.done.wait (!%p445_p2), %s386_s30, 32  }
  0xca   : > { %548 = vsyncadd (!%p445_p2), %s386_s30, 4294967264  ;;  %p15_p3 = scmp.ge.s32.totalorder %s629_s24, 4   ;;  %s724_s18 = smov %s555_s19 }
  0xcb   : > { %s725_s19 = smov %s559_s20  ;;  %s726_s20 = smov %s640_s27 }
  0xcc   : > { %s727_s21 = smov %s629_s24  ;;  %17 = sbr.rel (!%p15_p3) target bundleno = 3 (0x3), region = 75 }
  0xd3   :  { %391 = vsyncpa [#allocation3], 1 }
  0xd4   :  { %393 = vsyncpa [#allocation3 + $0x1], 1 }

</bundles_post_ra>
